<compile_context>
chip_gen: v5e
topology: v5e:2x2
jax: 0.10.0
libtpu: 0.0.40
codegen_flags: <defaults>
</compile_context>

<pallas_src>
from typing import NamedTuple

import jax
import jax.numpy as jnp
from jax.experimental import pallas as pl
from jax.experimental.pallas import tpu as pltpu

_LANE = 128
_SUBLANE = 8
_TM_CAP = 4096        # hard cap on the batch tile (keeps footprint v7x-safe)


def _round_up(x: int, m: int) -> int:
    return (x + m - 1) // m * m


def _layout(in_features: int, hidden: int, out_features: int):
    """Row layout of the packed parameter slab (each section 8-row aligned)."""
    lanes = max(_round_up(hidden, _LANE), _round_up(out_features, _LANE))
    narrow = out_features == 1            # VPU*XLU second layer, narrow output
    in_pad = _round_up(in_features, _SUBLANE)
    r_w1 = 0
    r_b1 = in_pad
    r_w2 = r_b1 + _SUBLANE
    w2_rows = _round_up(out_features, _SUBLANE) if narrow else lanes
    r_b2 = r_w2 + w2_rows
    rows = r_b2 + _SUBLANE
    return dict(lanes=lanes, narrow=narrow, rows=rows,
                r_w1=r_w1, r_b1=r_b1, r_w2=r_w2, r_b2=r_b2)


class SimpleNetParams(NamedTuple):
    slab: jax.Array          # packed (rows, lanes) parameter slab
    in_features: int
    hidden: int
    out_features: int


def pack_params(w1, b1, w2, b2, *, param_dtype=jnp.float32) -> SimpleNetParams:
    """Pack W1, b1, W2, b2 into one lane-dense, 8-row-aligned VMEM slab.

    narrow (out_features == 1) layout: W2 is stored TRANSPOSED (row j = W2[:, j])
    so the second layer is a lane-wise multiply + lane reduce in the kernel.
    Zero padding contributes nothing to any contraction.
    """
    in_features, hidden = w1.shape
    out_features = w2.shape[1]
    L = _layout(in_features, hidden, out_features)

    slab = jnp.zeros((L["rows"], L["lanes"]), jnp.float32)
    slab = slab.at[L["r_w1"]:L["r_w1"] + in_features, 0:hidden].set(
        jnp.asarray(w1, jnp.float32))
    slab = slab.at[L["r_b1"]:L["r_b1"] + 1, 0:hidden].set(
        jnp.reshape(jnp.asarray(b1, jnp.float32), (1, hidden)))
    if L["narrow"]:
        slab = slab.at[L["r_w2"]:L["r_w2"] + out_features, 0:hidden].set(
            jnp.asarray(w2, jnp.float32).T)
    else:
        slab = slab.at[L["r_w2"]:L["r_w2"] + hidden, 0:out_features].set(
            jnp.asarray(w2, jnp.float32))
    slab = slab.at[L["r_b2"]:L["r_b2"] + 1, 0:out_features].set(
        jnp.reshape(jnp.asarray(b2, jnp.float32), (1, out_features)))
    return SimpleNetParams(slab.astype(param_dtype), in_features, hidden, out_features)


def _make_kernel(in_features: int, hidden: int, out_features: int):
    L = _layout(in_features, hidden, out_features)
    lanes, narrow = L["lanes"], L["narrow"]
    r_w1, r_b1, r_w2, r_b2 = L["r_w1"], L["r_b1"], L["r_w2"], L["r_b2"]

    def mlp_kernel(x_ref, p_ref, o_ref):
        x = x_ref[...].astype(jnp.float32)                       # (tm, in)
        b1 = p_ref[r_b1:r_b1 + 1, :].astype(jnp.float32)         # (1, lanes)
        if in_features == 1:
            # K=1 contraction: VPU broadcast outer product, skip the MXU.
            w1_row = p_ref[r_w1:r_w1 + 1, :].astype(jnp.float32)
            h = x * w1_row                                       # (tm, lanes)
        else:
            w1 = p_ref[r_w1:r_w1 + in_features, :]
            h = jnp.dot(x.astype(p_ref.dtype), w1,
                        preferred_element_type=jnp.float32)      # MXU
        h = jnp.maximum(h + b1, 0.0)                             # bias + ReLU (VPU)

        if narrow:
            # out_features == 1: VPU multiply + XLU lane-reduce, no MXU pass
            # over zero-padded K, and a narrow (tm, 1) unpadded output.
            w2t = p_ref[r_w2:r_w2 + 1, :].astype(jnp.float32)    # (1, lanes) = W2^T
            y = jnp.sum(h * w2t, axis=-1, keepdims=True)         # (tm, 1)
            b2 = p_ref[r_b2:r_b2 + 1, :].astype(jnp.float32)[:, 0:1]
            o_ref[...] = (y + b2).astype(o_ref.dtype)
        else:
            w2 = p_ref[r_w2:r_w2 + lanes, :]                     # (lanes, lanes)
            y = jnp.dot(h.astype(p_ref.dtype), w2,
                        preferred_element_type=jnp.float32)      # MXU, lane-dense
            y = y + p_ref[r_b2:r_b2 + 1, :].astype(jnp.float32)
            o_ref[...] = y.astype(o_ref.dtype)

    return mlp_kernel


def _num_tensorcores() -> int:
    """v7x has 2 TensorCores per chip; everything else here runs 1."""
    try:
        kind = (getattr(jax.devices()[0], "device_kind", "") or "").lower()
        if "v7" in kind:
            return 2
    except Exception:
        pass
    return 1


def simple_net_forward(x, params: SimpleNetParams, *,
                       block_batch: int = 1024, num_tensorcores=None):
    in_features = params.in_features
    out_features = params.out_features
    slab = params.slab
    L = _layout(in_features, params.hidden, out_features)
    lanes, narrow, rows = L["lanes"], L["narrow"], L["rows"]

    B = x.shape[0]
    assert x.shape[1] == in_features

    num_tc = _num_tensorcores() if num_tensorcores is None else int(num_tensorcores)
    block_batch = _round_up(max(int(block_batch), _SUBLANE), _SUBLANE)

    b8 = _round_up(B, _SUBLANE)
    if num_tc > 1:
        tm = _round_up(pl.cdiv(b8, num_tc), _SUBLANE)   # one tile per TensorCore
    else:
        tm = b8                                         # whole batch in one grid step
    tm = min(tm, block_batch, _TM_CAP)

    num_tiles = pl.cdiv(B, tm)
    b_pad = num_tiles * tm
    if b_pad != B:                                      # skipped when tm divides B
        x = jnp.pad(x, ((0, b_pad - B), (0, 0)))

    out_cols = out_features if narrow else lanes

    # VMEM budget from the real (double-buffered) footprint, capped for v7x.
    itemsize = jnp.dtype(slab.dtype).itemsize
    footprint = (2 * tm * in_features * jnp.dtype(x.dtype).itemsize   # x tiles
                 + 2 * tm * out_cols * 4                              # out tiles
                 + 2 * rows * lanes * itemsize)                       # param slab
    vmem_limit = int(min(64 << 20, max(4 << 20, 2 * footprint)))

    kernel = _make_kernel(in_features, params.hidden, out_features)

    out = pl.pallas_call(
        kernel,
        out_shape=jax.ShapeDtypeStruct((b_pad, out_cols), jnp.float32),
        grid_spec=pltpu.PrefetchScalarGridSpec(
            num_scalar_prefetch=0,
            grid=(num_tiles,),
            in_specs=[
                pl.BlockSpec((tm, in_features), lambda i: (i, 0)),   # activations
                pl.BlockSpec((rows, lanes), lambda i: (0, 0)),       # resident params
            ],
            out_specs=pl.BlockSpec((tm, out_cols), lambda i: (i, 0)),
        ),
        compiler_params=pltpu.CompilerParams(
            dimension_semantics=("parallel",),
            vmem_limit_bytes=vmem_limit,
        ),
    )(x, slab)

    if b_pad != B:
        out = out[:B]
    if not narrow:
        out = out[:, :out_features]
    return out


def init_params(key, input_size=1, hidden_size=10, output_size=1):
    """Deterministic init mimicking torch.nn.Linear default (U[-1/sqrt(fan_in), +])."""
    k1, k2, k3, k4 = jax.random.split(key, 4)
    bound1 = 1.0 / jnp.sqrt(float(input_size))
    bound2 = 1.0 / jnp.sqrt(float(hidden_size))
    # stored as (in, out) so the kernel does x @ W (torch stores (out, in))
    w1 = jax.random.uniform(k1, (input_size, hidden_size), jnp.float32, -bound1, bound1)
    b1 = jax.random.uniform(k2, (1, hidden_size), jnp.float32, -bound1, bound1)
    w2 = jax.random.uniform(k3, (hidden_size, output_size), jnp.float32, -bound2, bound2)
    b2 = jax.random.uniform(k4, (1, output_size), jnp.float32, -bound2, bound2)
    return w1, b1, w2, b2


if __name__ == "__main__":
    key = jax.random.PRNGKey(0)
    kx, kp = jax.random.split(key)

    batch, input_size, hidden_size, output_size = 256, 1, 10, 1
    x = jax.random.normal(kx, (batch, input_size), jnp.float32)
    w1, b1, w2, b2 = init_params(kp, input_size, hidden_size, output_size)
    params = pack_params(w1, b1, w2, b2)       # one-time padding + packing (f32)

    out = simple_net_forward(x, params)        # grid=1 on v5e/v6e, 2 tiles on v7x
    jax.block_until_ready(out)

    # reference check in plain JAX (unpadded math)
    ref = jnp.maximum(x @ w1 + b1, 0.0) @ w2 + b2
    assert out.shape == (batch, output_size)
    assert jnp.allclose(out, ref, atol=1e-5, rtol=1e-5)

    print("KERNEL_OK")
</pallas_src>

<mosaic_0001>
module attributes {stable_mosaic.version = 11 : i64} {
  func.func @mlp_kernel(%arg0: i32, %arg1: memref<256x1xf32, #tpu.memory_space<vmem>>, %arg2: memref<32x128xf32, #tpu.memory_space<vmem>>, %arg3: memref<256x1xf32, #tpu.memory_space<vmem>>) attributes {dimension_semantics = [#tpu.dimension_semantics<parallel>], iteration_bounds = array<i64: 1>, scalar_prefetch = 0 : i64, scratch_operands = 0 : i64, tpu.core_type = #tpu.core_type<tc>, window_params = [{transform_indices = @transform_0, window_bounds = array<i64: 256, 1>}, {pipeline_mode = #tpu.pipeline_mode<synchronous>, transform_indices = @transform_1, window_bounds = array<i64: 32, 128>}, {transform_indices = @transform_2, window_bounds = array<i64: 256, 1>}]} {
    %c0 = arith.constant 0 : index
    %c0_0 = arith.constant 0 : index
    %0 = vector.load %arg1[%c0, %c0_0] : memref<256x1xf32, #tpu.memory_space<vmem>>, vector<256x1xf32>
    %c8 = arith.constant 8 : index
    %c0_1 = arith.constant 0 : index
    %1 = vector.load %arg2[%c8, %c0_1] : memref<32x128xf32, #tpu.memory_space<vmem>>, vector<1x128xf32>
    %c0_2 = arith.constant 0 : index
    %c0_3 = arith.constant 0 : index
    %2 = vector.load %arg2[%c0_2, %c0_3] : memref<32x128xf32, #tpu.memory_space<vmem>>, vector<1x128xf32>
    %3 = vector.broadcast %0 : vector<256x1xf32> to vector<256x128xf32>
    %4 = vector.broadcast %2 : vector<1x128xf32> to vector<256x128xf32>
    %5 = arith.mulf %3, %4 : vector<256x128xf32>
    %6 = vector.broadcast %1 : vector<1x128xf32> to vector<256x128xf32>
    %7 = arith.addf %5, %6 : vector<256x128xf32>
    %cst = arith.constant 0.000000e+00 : f32
    %8 = vector.broadcast %cst : f32 to vector<256x128xf32>
    %9 = arith.maximumf %7, %8 : vector<256x128xf32>
    %c16 = arith.constant 16 : index
    %c0_4 = arith.constant 0 : index
    %10 = vector.load %arg2[%c16, %c0_4] : memref<32x128xf32, #tpu.memory_space<vmem>>, vector<1x128xf32>
    %11 = vector.broadcast %10 : vector<1x128xf32> to vector<256x128xf32>
    %12 = arith.mulf %9, %11 : vector<256x128xf32>
    %cst_5 = arith.constant dense<0.000000e+00> : vector<256xf32>
    %13 = vector.multi_reduction <add>, %12, %cst_5 [1] : vector<256x128xf32> to vector<256xf32>
    %14 = vector.shape_cast %13 : vector<256xf32> to vector<256x1xf32>
    %c24 = arith.constant 24 : index
    %c0_6 = arith.constant 0 : index
    %15 = vector.load %arg2[%c24, %c0_6] : memref<32x128xf32, #tpu.memory_space<vmem>>, vector<1x128xf32>
    %16 = vector.extract_strided_slice %15 {offsets = [0, 0], sizes = [1, 1], strides = [1, 1]} : vector<1x128xf32> to vector<1x1xf32>
    %17 = vector.broadcast %16 : vector<1x1xf32> to vector<256x1xf32>
    %18 = arith.addf %14, %17 : vector<256x1xf32>
    %c0_7 = arith.constant 0 : index
    %c0_8 = arith.constant 0 : index
    %19 = vector.load %arg3[%c0_7, %c0_8] : memref<256x1xf32, #tpu.memory_space<vmem>>, vector<256x1xf32>
    tpu.vector_store %arg3[%c0_7, %c0_8], %18 {strides = array<i32>} : memref<256x1xf32, #tpu.memory_space<vmem>>, vector<256x1xf32>,
    return
  }
  func.func @transform_0(%arg0: i32) -> (i32, i32) {
    %c0_i32 = arith.constant 0 : i32
    %c0_i32_0 = arith.constant 0 : i32
    return %arg0, %c0_i32 : i32, i32
  }
  func.func @transform_1(%arg0: i32) -> (i32, i32) {
    %c0_i32 = arith.constant 0 : i32
    %c0_i32_0 = arith.constant 0 : i32
    %c0_i32_1 = arith.constant 0 : i32
    return %c0_i32, %c0_i32_0 : i32, i32
  }
  func.func @transform_2(%arg0: i32) -> (i32, i32) {
    %c0_i32 = arith.constant 0 : i32
    %c0_i32_0 = arith.constant 0 : i32
    return %arg0, %c0_i32 : i32, i32
  }
}

</mosaic_0001>

<bundles_post_ra>
// kernel: tpu_custom_call.1
= control target key start
LH: loop header
LB: loop body
LE: loop exit
PB: predicated region body
PF: predicated region fallthrough
CT: control target
= control target key end

     0   :  { %v480_v0 = vmov 0   ;;  %vm435_vm0 = vcmask 7168   ;;  %s868_s0 = inlined_call_operand.vmem [shape: f32[256,1], index: 0, kind: input, shape index: {}]   ;;  %s869_s1 = inlined_call_operand.vmem [shape: f32[32,128], index: 1, kind: input, shape index: {}]   ;;  %s870_s2 = inlined_call_operand.vmem [shape: f32[256,1], index: 2, kind: output, shape index: {}]  }
   0x1   :  { %475 = vset.pattern.permute.xlu2 %v480_v0  ;;  %474 = vset.pattern.permute.xlu1 %v480_v0  ;;  %v15_v1 = vld [vmem:[%s868_s0 + $0x20] sm:$0xff]  ;;  %v13_v2 = vld [vmem:[%s868_s0 + $0x10] sm:$0xff]  ;;  %v16_v4 = vld [vmem:[%s868_s0 + $0x28] sm:$0xff] }
   0x2   :  { %v11_v3 = vld [vmem:[%s868_s0] sm:$0xff]  ;;  %473 = vset.pattern.permute.xlu0 %v480_v0  ;;  %67 = vperm.xlu2 %475, %v15_v1   ;;  %v14_v5 = vld [vmem:[%s868_s0 + $0x18] sm:$0xff]  ;;  %v12_v6 = vld [vmem:[%s868_s0 + $0x8] sm:$0xff] }
   0x3   :  { %57 = vperm.xlu1 %474, %v13_v2   ;;  %47 = vperm.xlu0 %473, %v11_v3   ;;  %v19_v7 = vld [vmem:[%s868_s0 + $0x40] sm:$0xff]  ;;  %v18_v8 = vld [vmem:[%s868_s0 + $0x38] sm:$0xff]  ;;  %v17_v9 = vld [vmem:[%s868_s0 + $0x30] sm:$0xff] }
   0x4   :  { %v22_v10 = vld [vmem:[%s868_s0 + $0x58] sm:$0xff]  ;;  %v21_v11 = vld [vmem:[%s868_s0 + $0x50] sm:$0xff]  ;;  %v20_v12 = vld [vmem:[%s868_s0 + $0x48] sm:$0xff] }
   0x5   :  { %v25_v13 = vld [vmem:[%s868_s0 + $0x70] sm:$0xff]  ;;  %v24_v14 = vld [vmem:[%s868_s0 + $0x68] sm:$0xff]  ;;  %v23_v15 = vld [vmem:[%s868_s0 + $0x60] sm:$0xff] }
   0x6   :  { %v28_v16 = vld [vmem:[%s868_s0 + $0x88] sm:$0xff]  ;;  %v27_v17 = vld [vmem:[%s868_s0 + $0x80] sm:$0xff]  ;;  %v26_v18 = vld [vmem:[%s868_s0 + $0x78] sm:$0xff] }
   0x7   :  { %v31_v19 = vld [vmem:[%s868_s0 + $0xa0] sm:$0xff]  ;;  %v30_v20 = vld [vmem:[%s868_s0 + $0x98] sm:$0xff]  ;;  %v29_v21 = vld [vmem:[%s868_s0 + $0x90] sm:$0xff] }
   0x8   :  { %v34_v22 = vld [vmem:[%s868_s0 + $0xb8] sm:$0xff]  ;;  %v33_v23 = vld [vmem:[%s868_s0 + $0xb0] sm:$0xff]  ;;  %v32_v24 = vld [vmem:[%s868_s0 + $0xa8] sm:$0xff] }
   0x9   :  { %v37_v25 = vld [vmem:[%s868_s0 + $0xd0] sm:$0xff]  ;;  %v36_v26 = vld [vmem:[%s868_s0 + $0xc8] sm:$0xff]  ;;  %v35_v27 = vld [vmem:[%s868_s0 + $0xc0] sm:$0xff] }
   0xa   :  { %72 = vperm.xlu2 %475, %v16_v4   ;;  %v40_v28 = vld [vmem:[%s868_s0 + $0xe8] sm:$0xff]  ;;  %v39_v29 = vld [vmem:[%s868_s0 + $0xe0] sm:$0xff]  ;;  %v38_v30 = vld [vmem:[%s868_s0 + $0xd8] sm:$0xff] }
   0xb   :  { %62 = vperm.xlu1 %474, %v14_v5   ;;  %52 = vperm.xlu0 %473, %v12_v6   ;;  %v42_v31 = vld [vmem:[%s868_s0 + $0xf8] sm:$0xff]  ;;  %v41_v32 = vld [vmem:[%s868_s0 + $0xf0] sm:$0xff]  ;;  %v595_v35 = vld [vmem:[%s869_s1] ss:$0 sm:$0xff] }
   0xc   :  { %v600_v38 = vld [vmem:[%s869_s1 + $0x8] ss:$0 sm:$0xff]  ;;  %v609_v46 = vld [vmem:[%s869_s1 + $0x10] ss:$0 sm:$0xff] }
  0x12   :  { %87 = vperm.xlu2 %475, %v19_v7  }
  0x13   :  { %82 = vperm.xlu1 %474, %v18_v8   ;;  %77 = vperm.xlu0 %473, %v17_v9  }
  0x1a   :  { %102 = vperm.xlu2 %475, %v22_v10  }
  0x1b   :  { %97 = vperm.xlu1 %474, %v21_v11   ;;  %92 = vperm.xlu0 %473, %v20_v12  }
  0x22   :  { %117 = vperm.xlu2 %475, %v25_v13  }
  0x23   :  { %112 = vperm.xlu1 %474, %v24_v14   ;;  %107 = vperm.xlu0 %473, %v23_v15  }
  0x2a   :  { %132 = vperm.xlu2 %475, %v28_v16  }
  0x2b   :  { %127 = vperm.xlu1 %474, %v27_v17   ;;  %122 = vperm.xlu0 %473, %v26_v18  }
  0x32   :  { %147 = vperm.xlu2 %475, %v31_v19  }
  0x33   :  { %142 = vperm.xlu1 %474, %v30_v20   ;;  %137 = vperm.xlu0 %473, %v29_v21  }
  0x3a   :  { %162 = vperm.xlu2 %475, %v34_v22  }
  0x3b   :  { %157 = vperm.xlu1 %474, %v33_v23   ;;  %152 = vperm.xlu0 %473, %v32_v24  }
  0x42   :  { %177 = vperm.xlu2 %475, %v37_v25  }
  0x43   :  { %172 = vperm.xlu1 %474, %v36_v26   ;;  %167 = vperm.xlu0 %473, %v35_v27  }
  0x4a   :  { %192 = vperm.xlu2 %475, %v40_v28  }
  0x4b   :  { %187 = vperm.xlu1 %474, %v39_v29   ;;  %182 = vperm.xlu0 %473, %v38_v30  }
  0x53   :  { %202 = vperm.xlu1 %474, %v42_v31   ;;  %197 = vperm.xlu0 %473, %v41_v32  }
  0x5c   :  { %v68_v33 = vpop.permute.xlu2 %67 }
  0x5d   :  { %v210_v53 = vmul.f32 %v595_v35, %v68_v33 }
  0x5f   :  { %v243_v60 = vadd.f32 %v600_v38, %v210_v53 }
  0x61   :  { %v275_v4 = vmax.f32 %v243_v60, 0.0 }
  0x63   :  { %v309_v12 = vmul.f32 %v609_v46, %v275_v4 }
  0x64   :  { %v73_v34 = vpop.permute.xlu2 %72 }
  0x65   :  { %v211_v54 = vmul.f32 %v595_v35, %v73_v34 }
  0x67   :  { %v244_v61 = vadd.f32 %v600_v38, %v211_v54 }
  0x69   :  { %v276_v5 = vmax.f32 %v244_v61, 0.0 }
  0x6b   :  { %v310_v13 = vmul.f32 %v609_v46, %v276_v5 }
  0x6c   :  { %v88_v39 = vpop.permute.xlu2 %87 }
  0x6d   :  { %v214_v3 = vmul.f32 %v595_v35, %v88_v39 }
  0x6f   :  { %v247_v10 = vadd.f32 %v600_v38, %v214_v3 }
  0x71   :  { %v279_v18 = vmax.f32 %v247_v10, 0.0 }
  0x73   :  { %v313_v24 = vmul.f32 %v609_v46, %v279_v18 }
  0x74   :  { %v103_v55 = vpop.permute.xlu2 %102 }
  0x75   :  { %v58_v36 = vpop.permute.xlu1 %57  ;;  %v48_v37 = vpop.permute.xlu0 %47  ;;  %v217_v19 = vmul.f32 %v595_v35, %v103_v55 }
  0x76   :  { %v208_v40 = vmul.f32 %v595_v35, %v58_v36  ;;  %v206_v41 = vmul.f32 %v595_v35, %v48_v37 }
  0x77   :  { %v250_v25 = vadd.f32 %v600_v38, %v217_v19 }
  0x78   :  { %v241_v42 = vadd.f32 %v600_v38, %v208_v40  ;;  %v239_v43 = vadd.f32 %v600_v38, %v206_v41 }
  0x79   :  { %v282_v34 = vmax.f32 %v250_v25, 0.0 }
  0x7a   :  { %v273_v44 = vmax.f32 %v241_v42, 0.0  ;;  %v271_v45 = vmax.f32 %v239_v43, 0.0 }
  0x7c   :  { %v307_v47 = vmul.f32 %v609_v46, %v273_v44  ;;  %v305_v48 = vmul.f32 %v609_v46, %v271_v45  ;;  %v118_v8 = vpop.permute.xlu2 %117  ;;  %v316_v44 = vmul.f32 %v609_v46, %v282_v34 }
  0x7d   :  { %v63_v49 = vpop.permute.xlu1 %62  ;;  %v53_v50 = vpop.permute.xlu0 %52  ;;  %v220_v33 = vmul.f32 %v595_v35, %v118_v8 }
  0x7e   :  { %v209_v51 = vmul.f32 %v595_v35, %v63_v49  ;;  %v207_v52 = vmul.f32 %v595_v35, %v53_v50  ;;  %341 = vadd.xlane.f32.xlu1 %v307_v47  ;;  %337 = vadd.xlane.f32.xlu2 %v305_v48 }
  0x7f   :  { %v253_v41 = vadd.f32 %v600_v38, %v220_v33 }
  0x80   :  { %v242_v56 = vadd.f32 %v600_v38, %v209_v51  ;;  %v240_v57 = vadd.f32 %v600_v38, %v207_v52 }
  0x81   :  { %v285_v51 = vmax.f32 %v253_v41, 0.0 }
  0x82   :  { %v274_v58 = vmax.f32 %v242_v56, 0.0  ;;  %v272_v59 = vmax.f32 %v240_v57, 0.0 }
  0x83   :  { %v319_v57 = vmul.f32 %v609_v46, %v285_v51 }
  0x84   :  { %v308_v62 = vmul.f32 %v609_v46, %v274_v58  ;;  %v306_v63 = vmul.f32 %v609_v46, %v272_v59  ;;  %v133_v26 = vpop.permute.xlu2 %132 }
  0x85   :  { %v83_v0 = vpop.permute.xlu1 %82  ;;  %v78_v1 = vpop.permute.xlu0 %77  ;;  %v223_v52 = vmul.f32 %v595_v35, %v133_v26 }
  0x86   :  { %v212_v2 = vmul.f32 %v595_v35, %v78_v1  ;;  %343 = vadd.xlane.f32.xlu2 %v308_v62  ;;  %339 = vadd.xlane.f32.xlu0 %v306_v63  ;;  %v213_v6 = vmul.f32 %v595_v35, %v83_v0 }
  0x87   :  { %v256_v58 = vadd.f32 %v600_v38, %v223_v52 }
  0x88   :  { %v245_v7 = vadd.f32 %v600_v38, %v212_v2  ;;  %v246_v11 = vadd.f32 %v600_v38, %v213_v6 }
  0x89   :  { %v288_v2 = vmax.f32 %v256_v58, 0.0 }
  0x8a   :  { %v277_v9 = vmax.f32 %v245_v7, 0.0  ;;  %v278_v20 = vmax.f32 %v246_v11, 0.0 }
  0x8b   :  { %v322_v11 = vmul.f32 %v609_v46, %v288_v2 }
  0x8c   :  { %v311_v14 = vmul.f32 %v609_v46, %v277_v9  ;;  %v312_v28 = vmul.f32 %v609_v46, %v278_v20  ;;  %v148_v49 = vpop.permute.xlu2 %147 }
  0x8d   :  { %v98_v15 = vpop.permute.xlu1 %97  ;;  %v93_v16 = vpop.permute.xlu0 %92  ;;  %v226_v1 = vmul.f32 %v595_v35, %v148_v49 }
  0x8e   :  { %v215_v17 = vmul.f32 %v595_v35, %v93_v16  ;;  %345 = vadd.xlane.f32.xlu2 %v309_v12  ;;  %347 = vadd.xlane.f32.xlu0 %v310_v13  ;;  %v216_v21 = vmul.f32 %v595_v35, %v98_v15 }
  0x8f   :  { %349 = vadd.xlane.f32.xlu1 %v311_v14  ;;  %v259_v8 = vadd.f32 %v600_v38, %v226_v1 }
  0x90   :  { %v248_v22 = vadd.f32 %v600_v38, %v215_v17  ;;  %v249_v27 = vadd.f32 %v600_v38, %v216_v21 }
  0x91   :  { %v291_v16 = vmax.f32 %v259_v8, 0.0 }
  0x92   :  { %v280_v23 = vmax.f32 %v248_v22, 0.0  ;;  %v281_v36 = vmax.f32 %v249_v27, 0.0 }
  0x94   :  { %v314_v29 = vmul.f32 %v609_v46, %v280_v23  ;;  %v315_v43 = vmul.f32 %v609_v46, %v281_v36  ;;  %v163_v3 = vpop.permute.xlu2 %162  ;;  %v325_v23 = vmul.f32 %v609_v46, %v291_v16 }
  0x95   :  { %v113_v30 = vpop.permute.xlu1 %112  ;;  %v108_v31 = vpop.permute.xlu0 %107  ;;  %v229_v17 = vmul.f32 %v595_v35, %v163_v3 }
  0x96   :  { %v218_v32 = vmul.f32 %v595_v35, %v108_v31  ;;  %351 = vadd.xlane.f32.xlu2 %v312_v28  ;;  %353 = vadd.xlane.f32.xlu0 %v313_v24  ;;  %v219_v37 = vmul.f32 %v595_v35, %v113_v30 }
  0x97   :  { %355 = vadd.xlane.f32.xlu1 %v314_v29  ;;  %v262_v24 = vadd.f32 %v600_v38, %v229_v17 }
  0x98   :  { %v251_v39 = vadd.f32 %v600_v38, %v218_v32  ;;  %v252_v42 = vadd.f32 %v600_v38, %v219_v37 }
  0x99   :  { %v294_v32 = vmax.f32 %v262_v24, 0.0 }
  0x9a   :  { %v283_v40 = vmax.f32 %v251_v39, 0.0  ;;  %v284_v53 = vmax.f32 %v252_v42, 0.0 }
  0x9c   :  { %v317_v45 = vmul.f32 %v609_v46, %v283_v40  ;;  %v318_v60 = vmul.f32 %v609_v46, %v284_v53  ;;  %v178_v21 = vpop.permute.xlu2 %177 }
  0x9d   :  { %v128_v47 = vpop.permute.xlu1 %127  ;;  %v123_v48 = vpop.permute.xlu0 %122  ;;  %v232_v31 = vmul.f32 %v595_v35, %v178_v21 }
  0x9e   :  { %v221_v50 = vmul.f32 %v595_v35, %v123_v48  ;;  %357 = vadd.xlane.f32.xlu2 %v315_v43  ;;  %359 = vadd.xlane.f32.xlu0 %v316_v44  ;;  %v222_v54 = vmul.f32 %v595_v35, %v128_v47  ;;  %v328_v43 = vmul.f32 %v609_v46, %v294_v32 }
  0x9f   :  { %361 = vadd.xlane.f32.xlu1 %v317_v45  ;;  %v265_v39 = vadd.f32 %v600_v38, %v232_v31 }
  0xa0   :  { %v254_v55 = vadd.f32 %v600_v38, %v221_v50  ;;  %v255_v59 = vadd.f32 %v600_v38, %v222_v54 }
  0xa1   :  { %v297_v49 = vmax.f32 %v265_v39, 0.0 }
  0xa2   :  { %v286_v56 = vmax.f32 %v254_v55, 0.0  ;;  %v287_v4 = vmax.f32 %v255_v59, 0.0 }
  0xa3   :  { %v331_v55 = vmul.f32 %v609_v46, %v297_v49 }
  0xa4   :  { %v320_v61 = vmul.f32 %v609_v46, %v286_v56  ;;  %v321_v10 = vmul.f32 %v609_v46, %v287_v4  ;;  %v193_v40 = vpop.permute.xlu2 %192 }
  0xa5   :  { %v143_v62 = vpop.permute.xlu1 %142  ;;  %v138_v63 = vpop.permute.xlu0 %137  ;;  %v235_v50 = vmul.f32 %v595_v35, %v193_v40 }
  0xa6   :  { %v224_v0 = vmul.f32 %v595_v35, %v138_v63  ;;  %363 = vadd.xlane.f32.xlu2 %v318_v60  ;;  %365 = vadd.xlane.f32.xlu0 %v319_v57  ;;  %v225_v5 = vmul.f32 %v595_v35, %v143_v62 }
  0xa7   :  { %367 = vadd.xlane.f32.xlu1 %v320_v61  ;;  %v268_v56 = vadd.f32 %v600_v38, %v235_v50 }
  0xa8   :  { %v257_v6 = vadd.f32 %v600_v38, %v224_v0  ;;  %v258_v9 = vadd.f32 %v600_v38, %v225_v5 }
  0xa9   :  { %v300_v63 = vmax.f32 %v268_v56, 0.0 }
  0xaa   :  { %v289_v7 = vmax.f32 %v257_v6, 0.0  ;;  %v290_v18 = vmax.f32 %v258_v9, 0.0 }
  0xab   :  { %v334_v6 = vmul.f32 %v609_v46, %v300_v63 }
  0xac   :  { %v323_v12 = vmul.f32 %v609_v46, %v289_v7  ;;  %v324_v26 = vmul.f32 %v609_v46, %v290_v18 }
  0xad   :  { %v158_v13 = vpop.permute.xlu1 %157  ;;  %v153_v14 = vpop.permute.xlu0 %152 }
  0xae   :  { %v227_v15 = vmul.f32 %v595_v35, %v153_v14  ;;  %369 = vadd.xlane.f32.xlu2 %v321_v10  ;;  %371 = vadd.xlane.f32.xlu0 %v322_v11  ;;  %v228_v19 = vmul.f32 %v595_v35, %v158_v13 }
  0xaf   :  { %373 = vadd.xlane.f32.xlu1 %v323_v12 }
  0xb0   :  { %v260_v20 = vadd.f32 %v600_v38, %v227_v15  ;;  %v261_v25 = vadd.f32 %v600_v38, %v228_v19 }
  0xb2   :  { %v292_v22 = vmax.f32 %v260_v20, 0.0  ;;  %v293_v33 = vmax.f32 %v261_v25, 0.0 }
  0xb4   :  { %v326_v27 = vmul.f32 %v609_v46, %v292_v22  ;;  %v327_v42 = vmul.f32 %v609_v46, %v293_v33 }
  0xb5   :  { %v173_v28 = vpop.permute.xlu1 %172  ;;  %v168_v29 = vpop.permute.xlu0 %167 }
  0xb6   :  { %v230_v30 = vmul.f32 %v595_v35, %v168_v29  ;;  %375 = vadd.xlane.f32.xlu2 %v324_v26  ;;  %377 = vadd.xlane.f32.xlu0 %v325_v23  ;;  %v231_v34 = vmul.f32 %v595_v35, %v173_v28 }
  0xb7   :  { %379 = vadd.xlane.f32.xlu1 %v326_v27 }
  0xb8   :  { %v263_v36 = vadd.f32 %v600_v38, %v230_v30  ;;  %v264_v41 = vadd.f32 %v600_v38, %v231_v34 }
  0xba   :  { %v295_v37 = vmax.f32 %v263_v36, 0.0  ;;  %v296_v51 = vmax.f32 %v264_v41, 0.0 }
  0xbc   :  { %v329_v44 = vmul.f32 %v609_v46, %v295_v37  ;;  %v330_v58 = vmul.f32 %v609_v46, %v296_v51 }
  0xbd   :  { %v188_v45 = vpop.permute.xlu1 %187  ;;  %v183_v47 = vpop.permute.xlu0 %182 }
  0xbe   :  { %v233_v48 = vmul.f32 %v595_v35, %v183_v47  ;;  %381 = vadd.xlane.f32.xlu2 %v327_v42  ;;  %383 = vadd.xlane.f32.xlu0 %v328_v43  ;;  %v234_v52 = vmul.f32 %v595_v35, %v188_v45 }
  0xbf   :  { %385 = vadd.xlane.f32.xlu1 %v329_v44 }
  0xc0   :  { %v266_v53 = vadd.f32 %v600_v38, %v233_v48  ;;  %v267_v57 = vadd.f32 %v600_v38, %v234_v52 }
  0xc2   :  { %v298_v54 = vmax.f32 %v266_v53, 0.0  ;;  %v299_v0 = vmax.f32 %v267_v57, 0.0 }
  0xc4   :  { %v332_v59 = vmul.f32 %v609_v46, %v298_v54  ;;  %v333_v5 = vmul.f32 %v609_v46, %v299_v0 }
  0xc5   :  { %v203_v60 = vpop.permute.xlu1 %202  ;;  %v198_v61 = vpop.permute.xlu0 %197 }
  0xc6   :  { %v236_v62 = vmul.f32 %v595_v35, %v198_v61  ;;  %387 = vadd.xlane.f32.xlu2 %v330_v58  ;;  %389 = vadd.xlane.f32.xlu0 %v331_v55  ;;  %v237_v1 = vmul.f32 %v595_v35, %v203_v60  ;;  %v706_v35 = vld [vmem:[%s869_s1 + $0x18] ss:$0 sm:$0xff] }
  0xc7   :  { %391 = vadd.xlane.f32.xlu1 %v332_v59 }
  0xc8   :  { %v269_v2 = vadd.f32 %v600_v38, %v236_v62  ;;  %v270_v4 = vadd.f32 %v600_v38, %v237_v1 }
  0xca   :  { %v301_v3 = vmax.f32 %v269_v2, 0.0  ;;  %v302_v8 = vmax.f32 %v270_v4, 0.0 }
  0xcc   :  { %v335_v7 = vmul.f32 %v609_v46, %v301_v3  ;;  %v336_v9 = vmul.f32 %v609_v46, %v302_v8 }
  0xce   :  { %393 = vadd.xlane.f32.xlu2 %v333_v5  ;;  %395 = vadd.xlane.f32.xlu0 %v334_v6 }
  0xcf   :  { %397 = vadd.xlane.f32.xlu1 %v335_v7 }
  0xd6   :  { %399 = vadd.xlane.f32.xlu2 %v336_v9 }
  0xf1   :  { %v342_v38 = vpop.xlane.xlu1 %341  ;;  %v338_v10 = vpop.xlane.xlu2 %337 }
  0xf2   :  { %v405_v11 = vadd.f32 %v706_v35, %v342_v38  ;;  %v403_v12 = vadd.f32 %v706_v35, %v338_v10 }
  0xf4   :  { %438 = vst.msk [vmem:[%s870_s2 + $0x10] sm:$0xff] %vm435_vm0, %v405_v11 }
  0xf5   :  { %436 = vst.msk [vmem:[%s870_s2] sm:$0xff] %vm435_vm0, %v403_v12 }
  0xf9   :  { %v344_v46 = vpop.xlane.xlu2 %343  ;;  %v340_v13 = vpop.xlane.xlu0 %339 }
  0xfa   :  { %v406_v14 = vadd.f32 %v706_v35, %v344_v46  ;;  %v404_v15 = vadd.f32 %v706_v35, %v340_v13 }
  0xfc   :  { %439 = vst.msk [vmem:[%s870_s2 + $0x18] sm:$0xff] %vm435_vm0, %v406_v14 }
  0xfd   :  { %437 = vst.msk [vmem:[%s870_s2 + $0x8] sm:$0xff] %vm435_vm0, %v404_v15 }
 0x101   :  { %v346_v16 = vpop.xlane.xlu2 %345  ;;  %v348_v17 = vpop.xlane.xlu0 %347 }
 0x102   :  { %v407_v18 = vadd.f32 %v706_v35, %v346_v16  ;;  %v350_v19 = vpop.xlane.xlu1 %349  ;;  %v408_v20 = vadd.f32 %v706_v35, %v348_v17 }
 0x103   :  { %v409_v21 = vadd.f32 %v706_v35, %v350_v19 }
 0x104   :  { %440 = vst.msk [vmem:[%s870_s2 + $0x20] sm:$0xff] %vm435_vm0, %v407_v18 }
 0x105   :  { %442 = vst.msk [vmem:[%s870_s2 + $0x30] sm:$0xff] %vm435_vm0, %v409_v21 }
 0x106   :  { %441 = vst.msk [vmem:[%s870_s2 + $0x28] sm:$0xff] %vm435_vm0, %v408_v20 }
 0x109   :  { %v352_v22 = vpop.xlane.xlu2 %351  ;;  %v354_v23 = vpop.xlane.xlu0 %353 }
 0x10a   :  { %v410_v24 = vadd.f32 %v706_v35, %v352_v22  ;;  %v356_v25 = vpop.xlane.xlu1 %355  ;;  %v411_v26 = vadd.f32 %v706_v35, %v354_v23 }
 0x10b   :  { %v412_v27 = vadd.f32 %v706_v35, %v356_v25 }
 0x10c   :  { %443 = vst.msk [vmem:[%s870_s2 + $0x38] sm:$0xff] %vm435_vm0, %v410_v24 }
 0x10d   :  { %445 = vst.msk [vmem:[%s870_s2 + $0x48] sm:$0xff] %vm435_vm0, %v412_v27 }
 0x10e   :  { %444 = vst.msk [vmem:[%s870_s2 + $0x40] sm:$0xff] %vm435_vm0, %v411_v26 }
 0x111   :  { %v358_v28 = vpop.xlane.xlu2 %357  ;;  %v360_v29 = vpop.xlane.xlu0 %359 }
 0x112   :  { %v413_v30 = vadd.f32 %v706_v35, %v358_v28  ;;  %v362_v31 = vpop.xlane.xlu1 %361  ;;  %v414_v32 = vadd.f32 %v706_v35, %v360_v29 }
 0x113   :  { %v415_v33 = vadd.f32 %v706_v35, %v362_v31 }
 0x114   :  { %446 = vst.msk [vmem:[%s870_s2 + $0x50] sm:$0xff] %vm435_vm0, %v413_v30 }
 0x115   :  { %448 = vst.msk [vmem:[%s870_s2 + $0x60] sm:$0xff] %vm435_vm0, %v415_v33 }
 0x116   :  { %447 = vst.msk [vmem:[%s870_s2 + $0x58] sm:$0xff] %vm435_vm0, %v414_v32 }
 0x119   :  { %v364_v34 = vpop.xlane.xlu2 %363  ;;  %v366_v36 = vpop.xlane.xlu0 %365 }
 0x11a   :  { %v416_v37 = vadd.f32 %v706_v35, %v364_v34  ;;  %v368_v39 = vpop.xlane.xlu1 %367  ;;  %v417_v40 = vadd.f32 %v706_v35, %v366_v36 }
 0x11b   :  { %v418_v41 = vadd.f32 %v706_v35, %v368_v39 }
 0x11c   :  { %449 = vst.msk [vmem:[%s870_s2 + $0x68] sm:$0xff] %vm435_vm0, %v416_v37 }
 0x11d   :  { %451 = vst.msk [vmem:[%s870_s2 + $0x78] sm:$0xff] %vm435_vm0, %v418_v41 }
 0x11e   :  { %450 = vst.msk [vmem:[%s870_s2 + $0x70] sm:$0xff] %vm435_vm0, %v417_v40 }
 0x121   :  { %v370_v42 = vpop.xlane.xlu2 %369  ;;  %v372_v43 = vpop.xlane.xlu0 %371 }
 0x122   :  { %v419_v44 = vadd.f32 %v706_v35, %v370_v42  ;;  %v374_v45 = vpop.xlane.xlu1 %373  ;;  %v420_v47 = vadd.f32 %v706_v35, %v372_v43 }
 0x123   :  { %v421_v48 = vadd.f32 %v706_v35, %v374_v45 }
 0x124   :  { %452 = vst.msk [vmem:[%s870_s2 + $0x80] sm:$0xff] %vm435_vm0, %v419_v44 }
 0x125   :  { %454 = vst.msk [vmem:[%s870_s2 + $0x90] sm:$0xff] %vm435_vm0, %v421_v48 }
 0x126   :  { %453 = vst.msk [vmem:[%s870_s2 + $0x88] sm:$0xff] %vm435_vm0, %v420_v47 }
 0x129   :  { %v376_v49 = vpop.xlane.xlu2 %375  ;;  %v378_v50 = vpop.xlane.xlu0 %377 }
 0x12a   :  { %v422_v51 = vadd.f32 %v706_v35, %v376_v49  ;;  %v380_v52 = vpop.xlane.xlu1 %379  ;;  %v423_v53 = vadd.f32 %v706_v35, %v378_v50 }
 0x12b   :  { %v424_v54 = vadd.f32 %v706_v35, %v380_v52 }
 0x12c   :  { %455 = vst.msk [vmem:[%s870_s2 + $0x98] sm:$0xff] %vm435_vm0, %v422_v51 }
 0x12d   :  { %457 = vst.msk [vmem:[%s870_s2 + $0xa8] sm:$0xff] %vm435_vm0, %v424_v54 }
 0x12e   :  { %456 = vst.msk [vmem:[%s870_s2 + $0xa0] sm:$0xff] %vm435_vm0, %v423_v53 }
 0x131   :  { %v382_v55 = vpop.xlane.xlu2 %381  ;;  %v384_v56 = vpop.xlane.xlu0 %383 }
 0x132   :  { %v425_v57 = vadd.f32 %v706_v35, %v382_v55  ;;  %v386_v58 = vpop.xlane.xlu1 %385  ;;  %v426_v59 = vadd.f32 %v706_v35, %v384_v56 }
 0x133   :  { %v427_v60 = vadd.f32 %v706_v35, %v386_v58 }
 0x134   :  { %458 = vst.msk [vmem:[%s870_s2 + $0xb0] sm:$0xff] %vm435_vm0, %v425_v57 }
 0x135   :  { %460 = vst.msk [vmem:[%s870_s2 + $0xc0] sm:$0xff] %vm435_vm0, %v427_v60 }
 0x136   :  { %459 = vst.msk [vmem:[%s870_s2 + $0xb8] sm:$0xff] %vm435_vm0, %v426_v59 }
 0x139   :  { %v388_v61 = vpop.xlane.xlu2 %387  ;;  %v390_v62 = vpop.xlane.xlu0 %389 }
 0x13a   :  { %v428_v63 = vadd.f32 %v706_v35, %v388_v61  ;;  %v392_v0 = vpop.xlane.xlu1 %391  ;;  %v429_v1 = vadd.f32 %v706_v35, %v390_v62 }
 0x13b   :  { %v430_v2 = vadd.f32 %v706_v35, %v392_v0 }
 0x13c   :  { %461 = vst.msk [vmem:[%s870_s2 + $0xc8] sm:$0xff] %vm435_vm0, %v428_v63 }
 0x13d   :  { %463 = vst.msk [vmem:[%s870_s2 + $0xd8] sm:$0xff] %vm435_vm0, %v430_v2 }
 0x13e   :  { %462 = vst.msk [vmem:[%s870_s2 + $0xd0] sm:$0xff] %vm435_vm0, %v429_v1 }
 0x141   :  { %v394_v3 = vpop.xlane.xlu2 %393  ;;  %v396_v4 = vpop.xlane.xlu0 %395 }
 0x142   :  { %v431_v5 = vadd.f32 %v706_v35, %v394_v3  ;;  %v398_v6 = vpop.xlane.xlu1 %397  ;;  %v432_v7 = vadd.f32 %v706_v35, %v396_v4 }
 0x143   :  { %v433_v8 = vadd.f32 %v706_v35, %v398_v6 }
 0x144   :  { %464 = vst.msk [vmem:[%s870_s2 + $0xe0] sm:$0xff] %vm435_vm0, %v431_v5 }
 0x145   :  { %466 = vst.msk [vmem:[%s870_s2 + $0xf0] sm:$0xff] %vm435_vm0, %v433_v8 }
 0x146   :  { %465 = vst.msk [vmem:[%s870_s2 + $0xe8] sm:$0xff] %vm435_vm0, %v432_v7 }
 0x149   :  { %v400_v9 = vpop.xlane.xlu2 %399 }
 0x14a   :  { %v434_v38 = vadd.f32 %v706_v35, %v400_v9 }
 0x14c   :  { %467 = vst.msk [vmem:[%s870_s2 + $0xf8] sm:$0xff] %vm435_vm0, %v434_v38 }

</bundles_post_ra>
